<compile_context>
chip_gen: v6e
topology: v6e:2x2x1
jax: 0.10.0
libtpu: 0.0.40
codegen_flags: <defaults>
</compile_context>

<pallas_src>
import functools
import math

import jax
import jax.numpy as jnp
from jax.experimental import pallas as pl
from jax.experimental.pallas import tpu as pltpu


def _bert_attention_kernel(
    hs_ref,      # (Bblk, S, H)   f32   hidden_states block (also the residual)
    wqkv_ref,    # (1, H, 3d)     bf16  per-head fused [q|k|v] weight, (in, out)
    bqkv_ref,    # (1, 1, 3d)     f32   per-head fused bias (q part pre-scaled)
    wo_ref,      # (1, d, H)      bf16  per-head rows of the output dense weight
    bo_ref,      # (1, H)         f32   output dense bias
    gamma_ref,   # (1, H)         f32   LayerNorm gamma
    beta_ref,    # (1, H)         f32   LayerNorm beta
    out_ref,     # (Bblk, S, H)
    hs16_ref,    # scratch (Bblk, S, H) bf16 — cached cast of the hidden block
    acc_ref,     # scratch (Bblk, S, H) f32  — per-head output-dense accumulator
    *,
    head_dim: int,
    eps: float,
):
    h = pl.program_id(1)
    d = head_dim
    Bblk, S, H = hs_ref.shape

    @pl.when(h == 0)
    def _():
        hs16_ref[...] = hs_ref[...].astype(jnp.bfloat16)
        acc_ref[...] = jnp.zeros_like(acc_ref)

    # --- per-head fused QKV projection: (Bblk*S, H) @ (H, 3d), f32 accumulate --
    qkv = jnp.dot(hs16_ref[...].reshape(Bblk * S, H), wqkv_ref[0],
                  preferred_element_type=jnp.float32) + bqkv_ref[0]   # (Bblk*S, 3d)
    qkv = qkv.reshape(Bblk, S, 3 * d)
    q = qkv[..., :d].astype(jnp.bfloat16)          # 1/sqrt(d) already folded in
    k = qkv[..., d:2 * d].astype(jnp.bfloat16)
    v = qkv[..., 2 * d:].astype(jnp.bfloat16)

    # --- attention for this head (contract trailing dim: no K transpose) ------
    s = jnp.einsum("bqd,bkd->bqk", q, k,
                   preferred_element_type=jnp.float32)                # (Bblk,S,S) f32
    m = jnp.max(s, axis=-1, keepdims=True)
    p = jnp.exp(s - m)                                # f32 (v5e has no bf16 EUP/VPU)
    p = p * pl.reciprocal(jnp.sum(p, axis=-1, keepdims=True), approx=True)
    # TODO(synk): attention_probs dropout omitted (eval / p=0 semantics).
    ctx = jnp.einsum("bqk,bkd->bqd", p.astype(jnp.bfloat16), v,
                     preferred_element_type=jnp.float32)              # (Bblk,S,d)

    # --- per-head slice of the output dense, accumulated across heads ---------
    acc_ref[...] += jnp.dot(ctx.reshape(Bblk * S, d).astype(jnp.bfloat16),
                            wo_ref[0],
                            preferred_element_type=jnp.float32).reshape(Bblk, S, H)

    # --- last head: bias + residual + LayerNorm (all f32 elementwise) ---------
    @pl.when(h == pl.num_programs(1) - 1)
    def _():
        x = acc_ref[...] + bo_ref[...] + hs_ref[...]
        mean = jnp.mean(x, axis=-1, keepdims=True)
        var = jnp.mean((x - mean) ** 2, axis=-1, keepdims=True)  # biased (PyTorch LN)
        y = (x - mean) * jax.lax.rsqrt(var + eps)
        out_ref[...] = (y * gamma_ref[...] + beta_ref[...]).astype(out_ref.dtype)


def _vmem_limit_bytes():
    """Generation-aware scoped-VMEM limit: ~80% of capacity, capped at 110 MiB.
    (v7x: ~51 MiB of 64 MiB; v5e/v6e: ~102 MiB of 128 MiB.)"""
    cap = 64 * 1024 * 1024  # conservative default if the hardware query fails
    try:
        cap = int(getattr(pltpu.get_tpu_info(), "vmem_capacity_bytes", cap))
    except Exception:
        pass  # hardware query only; never masks kernel tracing/lowering errors
    return int(min(cap * 0.8, 110 * 1024 * 1024))


def _pick_block_b(B, S):
    """Batch rows per grid step: fill the MXU M dim (~256 rows) at small S, but
    keep >=2 blocks on the parallel batch axis when possible (v7x megacore)."""
    target = max(1, 256 // max(S, 1))
    divisors = [b for b in range(1, B + 1) if B % b == 0]
    block_b = max([b for b in divisors if b <= target] or [1])
    if B // block_b < 2:
        two_plus = [b for b in divisors if B // b >= 2]
        if two_plus:
            block_b = max(two_plus)
    return block_b


def _build_call(B, S, H, num_heads, eps, out_dtype, block_b):
    d = H // num_heads
    kernel = functools.partial(_bert_attention_kernel, head_dim=d, eps=eps)

    # Advisory cost estimate for the XLA scheduler.
    flops = B * (2 * S * H * 3 * H        # QKV projection
                 + 4 * S * S * H          # Q@K^T + probs@V (summed over heads)
                 + 2 * S * H * H)         # output dense
    transcendentals = B * num_heads * S * S
    bytes_accessed = (2 * B * S * H * 4               # hidden in + out (f32)
                      + (3 * H * H + H * H) * 2       # bf16 weights
                      + (3 * H + 3 * H) * 4)          # biases + LN params

    return pl.pallas_call(
        kernel,
        out_shape=jax.ShapeDtypeStruct((B, S, H), out_dtype),
        grid_spec=pltpu.PrefetchScalarGridSpec(
            num_scalar_prefetch=0,
            grid=(B // block_b, num_heads),           # heads last = reduction axis
            in_specs=[
                pl.BlockSpec((block_b, S, H), lambda b, h: (b, 0, 0)),  # hidden
                pl.BlockSpec((1, H, 3 * d), lambda b, h: (h, 0, 0)),    # qkv W (head h)
                pl.BlockSpec((1, 1, 3 * d), lambda b, h: (h, 0, 0)),    # qkv b (head h)
                pl.BlockSpec((1, d, H), lambda b, h: (h, 0, 0)),        # Wo rows (head h)
                pl.BlockSpec((1, H), lambda b, h: (0, 0)),              # bo
                pl.BlockSpec((1, H), lambda b, h: (0, 0)),              # gamma
                pl.BlockSpec((1, H), lambda b, h: (0, 0)),              # beta
            ],
            out_specs=pl.BlockSpec((block_b, S, H), lambda b, h: (b, 0, 0)),
            scratch_shapes=[
                pltpu.VMEM((block_b, S, H), jnp.bfloat16),   # cached bf16 hidden
                pltpu.VMEM((block_b, S, H), jnp.float32),    # output-dense accumulator
            ],
        ),
        compiler_params=pltpu.CompilerParams(
            dimension_semantics=("parallel", "arbitrary"),
            vmem_limit_bytes=_vmem_limit_bytes(),
        ),
        cost_estimate=pl.CostEstimate(
            flops=flops,
            transcendentals=transcendentals,
            bytes_accessed=bytes_accessed,
        ),
    )


def prepare_params(params, *, num_heads):
    """One-time preprocessing of PyTorch-layout (out, in) weights.

    Fuses Q/K/V per head into a (nh, H, 3d) bf16 weight, folds 1/sqrt(d) into
    the Q weight/bias, and reshapes the output dense weight into per-head row
    blocks (nh, d, H).  Call once; reuse the result across forward calls."""
    H = params["wq"].shape[0]
    d = H // num_heads
    inv = 1.0 / math.sqrt(d)

    def head_cols(w):                          # (out, in) -> (in, nh, d)
        return w.T.reshape(H, num_heads, d)

    wqkv = jnp.concatenate(
        [head_cols(params["wq"]) * inv,        # fold 1/sqrt(d) into Q
         head_cols(params["wk"]),
         head_cols(params["wv"])], axis=-1)                      # (H, nh, 3d)
    wqkv = jnp.transpose(wqkv, (1, 0, 2)).astype(jnp.bfloat16)   # (nh, H, 3d)

    bqkv = jnp.concatenate(
        [params["bq"].reshape(num_heads, 1, d) * inv,
         params["bk"].reshape(num_heads, 1, d),
         params["bv"].reshape(num_heads, 1, d)], axis=-1).astype(jnp.float32)

    return {
        "wqkv": wqkv,
        "bqkv": bqkv,                                            # (nh, 1, 3d)
        "wo": params["wo"].T.reshape(num_heads, d, H).astype(jnp.bfloat16),
        "bo": params["bo"].reshape(1, H).astype(jnp.float32),
        "gamma": params["gamma"].reshape(1, H).astype(jnp.float32),
        "beta": params["beta"].reshape(1, H).astype(jnp.float32),
    }


def bert_generation_attention(hidden_states, prepared, *, num_heads, eps=1e-12):
    """hidden_states: (B, S, H); prepared: output of prepare_params()."""
    B, S, H = hidden_states.shape
    block_b = _pick_block_b(B, S)
    call = _build_call(B, S, H, num_heads, eps, hidden_states.dtype, block_b)
    return call(hidden_states, prepared["wqkv"], prepared["bqkv"], prepared["wo"],
                prepared["bo"], prepared["gamma"], prepared["beta"])


def _reference(hidden_states, params, *, num_heads, eps=1e-12):
    """Pure-JAX reference mirroring the PyTorch forward (eval mode)."""
    B, S, H = hidden_states.shape
    d = H // num_heads

    def lin(x, w, b):
        return jnp.einsum("bsh,oh->bso", x, w) + b

    q = lin(hidden_states, params["wq"], params["bq"])
    k = lin(hidden_states, params["wk"], params["bk"])
    v = lin(hidden_states, params["wv"], params["bv"])

    def split(x):
        return x.reshape(B, S, num_heads, d).transpose(0, 2, 1, 3)

    q, k, v = split(q), split(k), split(v)
    scores = jnp.einsum("bhqd,bhkd->bhqk", q, k) / math.sqrt(d)
    probs = jax.nn.softmax(scores, axis=-1)
    ctx = jnp.einsum("bhqk,bhkd->bhqd", probs, v)
    ctx = ctx.transpose(0, 2, 1, 3).reshape(B, S, H)

    out = lin(ctx, params["wo"], params["bo"])
    x = out + hidden_states
    mean = jnp.mean(x, axis=-1, keepdims=True)
    var = jnp.mean((x - mean) ** 2, axis=-1, keepdims=True)
    return (x - mean) * jax.lax.rsqrt(var + eps) * params["gamma"] + params["beta"]


if __name__ == "__main__":
    def run_case(B, S, H, NH, key):
        keys = jax.random.split(key, 11)
        scale = 0.02
        params = {
            "wq": scale * jax.random.normal(keys[0], (H, H), jnp.float32),
            "bq": scale * jax.random.normal(keys[1], (H,), jnp.float32),
            "wk": scale * jax.random.normal(keys[2], (H, H), jnp.float32),
            "bk": scale * jax.random.normal(keys[3], (H,), jnp.float32),
            "wv": scale * jax.random.normal(keys[4], (H, H), jnp.float32),
            "bv": scale * jax.random.normal(keys[5], (H,), jnp.float32),
            "wo": scale * jax.random.normal(keys[6], (H, H), jnp.float32),
            "bo": scale * jax.random.normal(keys[7], (H,), jnp.float32),
            "gamma": 1.0 + 0.1 * jax.random.normal(keys[8], (H,), jnp.float32),
            "beta": 0.1 * jax.random.normal(keys[9], (H,), jnp.float32),
        }
        hidden_states = jax.random.normal(keys[10], (B, S, H), jnp.float32)

        prepared = prepare_params(params, num_heads=NH)          # one-time prep
        out = bert_generation_attention(hidden_states, prepared, num_heads=NH)
        out = jax.block_until_ready(out)

        ref = _reference(hidden_states, params, num_heads=NH)
        assert out.shape == (B, S, H)
        # bf16 matmul operands (f32 accumulation) + approx reciprocal ->
        # slightly looser tolerance than pure f32.
        assert jnp.allclose(out, ref, atol=3e-3, rtol=3e-3), (
            f"mismatch vs. JAX reference (B={B}, S={S}, H={H}, NH={NH})")

    root = jax.random.PRNGKey(0)
    k1, k2 = jax.random.split(root)
    run_case(2, 16, 128, 2, k1)   # block_b=1, grid=(2, 2)
    run_case(4, 8, 256, 4, k2)    # block_b=2, grid=(2, 4) — exercises row batching

    print("KERNEL_OK")
</pallas_src>

<mosaic_0001>
module attributes {stable_mosaic.version = 11 : i64} {
  func.func @_bert_attention_kernel(%arg0: i32, %arg1: i32, %arg2: memref<1x16x128xf32, #tpu.memory_space<vmem>>, %arg3: memref<1x128x192xbf16, #tpu.memory_space<vmem>>, %arg4: memref<1x1x192xf32, #tpu.memory_space<vmem>>, %arg5: memref<1x64x128xbf16, #tpu.memory_space<vmem>>, %arg6: memref<1x128xf32, #tpu.memory_space<vmem>>, %arg7: memref<1x128xf32, #tpu.memory_space<vmem>>, %arg8: memref<1x128xf32, #tpu.memory_space<vmem>>, %arg9: memref<1x16x128xf32, #tpu.memory_space<vmem>>, %arg10: memref<1x16x128xbf16, #tpu.memory_space<vmem>>, %arg11: memref<1x16x128xf32, #tpu.memory_space<vmem>>) attributes {dimension_semantics = [#tpu.dimension_semantics<parallel>, #tpu.dimension_semantics<arbitrary>], iteration_bounds = array<i64: 2, 2>, scalar_prefetch = 0 : i64, scratch_operands = 2 : i64, tpu.core_type = #tpu.core_type<tc>, window_params = [{transform_indices = @transform_0, window_bounds = array<i64: 1, 16, 128>}, {transform_indices = @transform_1, window_bounds = array<i64: 1, 128, 192>}, {transform_indices = @transform_2, window_bounds = array<i64: 1, 1, 192>}, {transform_indices = @transform_3, window_bounds = array<i64: 1, 64, 128>}, {pipeline_mode = #tpu.pipeline_mode<synchronous>, transform_indices = @transform_4, window_bounds = array<i64: 1, 128>}, {pipeline_mode = #tpu.pipeline_mode<synchronous>, transform_indices = @transform_5, window_bounds = array<i64: 1, 128>}, {pipeline_mode = #tpu.pipeline_mode<synchronous>, transform_indices = @transform_6, window_bounds = array<i64: 1, 128>}, {transform_indices = @transform_7, window_bounds = array<i64: 1, 16, 128>}]} {
    %c0_i32 = arith.constant 0 : i32
    %0 = arith.cmpi eq, %arg1, %c0_i32 : i32
    %1 = arith.extui %0 : i1 to i32
    %c0_i32_0 = arith.constant 0 : i32
    %2 = arith.cmpi ne, %1, %c0_i32_0 : i32
    scf.if %2 {
      %c0_24 = arith.constant 0 : index
      %c0_25 = arith.constant 0 : index
      %c0_26 = arith.constant 0 : index
      %44 = vector.load %arg2[%c0_24, %c0_25, %c0_26] : memref<1x16x128xf32, #tpu.memory_space<vmem>>, vector<1x16x128xf32>
      %45 = arith.truncf %44 : vector<1x16x128xf32> to vector<1x16x128xbf16>
      %c0_27 = arith.constant 0 : index
      %c0_28 = arith.constant 0 : index
      %c0_29 = arith.constant 0 : index
      %46 = vector.load %arg10[%c0_27, %c0_28, %c0_29] : memref<1x16x128xbf16, #tpu.memory_space<vmem>>, vector<1x16x128xbf16>
      tpu.vector_store %arg10[%c0_27, %c0_28, %c0_29], %45 {strides = array<i32>} : memref<1x16x128xbf16, #tpu.memory_space<vmem>>, vector<1x16x128xbf16>,
      %cst_30 = arith.constant 0.000000e+00 : f32
      %47 = vector.broadcast %cst_30 : f32 to vector<1x16x128xf32>
      %c0_31 = arith.constant 0 : index
      %c0_32 = arith.constant 0 : index
      %c0_33 = arith.constant 0 : index
      %48 = vector.load %arg11[%c0_31, %c0_32, %c0_33] : memref<1x16x128xf32, #tpu.memory_space<vmem>>, vector<1x16x128xf32>
      tpu.vector_store %arg11[%c0_31, %c0_32, %c0_33], %47 {strides = array<i32>} : memref<1x16x128xf32, #tpu.memory_space<vmem>>, vector<1x16x128xf32>,
    } else {
    }
    %c0 = arith.constant 0 : index
    %c0_1 = arith.constant 0 : index
    %c0_2 = arith.constant 0 : index
    %3 = vector.load %arg10[%c0, %c0_1, %c0_2] : memref<1x16x128xbf16, #tpu.memory_space<vmem>>, vector<1x16x128xbf16>
    %4 = vector.shape_cast %3 : vector<1x16x128xbf16> to vector<16x128xbf16>
    %c0_3 = arith.constant 0 : index
    %c0_4 = arith.constant 0 : index
    %c0_5 = arith.constant 0 : index
    %5 = vector.load %arg3[%c0_3, %c0_4, %c0_5] : memref<1x128x192xbf16, #tpu.memory_space<vmem>>, vector<1x128x192xbf16>
    %6 = vector.shape_cast %5 : vector<1x128x192xbf16> to vector<128x192xbf16>
    %cst = arith.constant dense<0.000000e+00> : vector<16x192xf32>
    %7 = tpu.matmul %4, %6, %cst {dimension_numbers = #tpu.dot_dimension_numbers<[1], [0], [0], [1], [0, 0, 1, 1], [], []>} : vector<16x128xbf16>, vector<128x192xbf16>, vector<16x192xf32> -> vector<16x192xf32>
    %c0_6 = arith.constant 0 : index
    %c0_7 = arith.constant 0 : index
    %c0_8 = arith.constant 0 : index
    %8 = vector.load %arg4[%c0_6, %c0_7, %c0_8] : memref<1x1x192xf32, #tpu.memory_space<vmem>>, vector<1x1x192xf32>
    %9 = vector.shape_cast %8 : vector<1x1x192xf32> to vector<1x192xf32>
    %10 = vector.broadcast %9 : vector<1x192xf32> to vector<16x192xf32>
    %11 = arith.addf %7, %10 : vector<16x192xf32>
    %12 = vector.shape_cast %11 : vector<16x192xf32> to vector<1x16x192xf32>
    %13 = vector.extract_strided_slice %12 {offsets = [0, 0, 0], sizes = [1, 16, 64], strides = [1, 1, 1]} : vector<1x16x192xf32> to vector<1x16x64xf32>
    %14 = arith.truncf %13 : vector<1x16x64xf32> to vector<1x16x64xbf16>
    %15 = vector.extract_strided_slice %12 {offsets = [0, 0, 64], sizes = [1, 16, 64], strides = [1, 1, 1]} : vector<1x16x192xf32> to vector<1x16x64xf32>
    %16 = arith.truncf %15 : vector<1x16x64xf32> to vector<1x16x64xbf16>
    %17 = vector.extract_strided_slice %12 {offsets = [0, 0, 128], sizes = [1, 16, 64], strides = [1, 1, 1]} : vector<1x16x192xf32> to vector<1x16x64xf32>
    %18 = arith.truncf %17 : vector<1x16x64xf32> to vector<1x16x64xbf16>
    "tpu.trace_start"() <{level = 10 : i32, message = "bqd,bkd->bqk"}> : () -> ()
    %cst_9 = arith.constant dense<0.000000e+00> : vector<1x16x16xf32>
    %19 = tpu.matmul %14, %16, %cst_9 {dimension_numbers = #tpu.dot_dimension_numbers<[2], [2], [1], [1], [0, 0, 0, 1, 1, 1], [0], [0]>} : vector<1x16x64xbf16>, vector<1x16x64xbf16>, vector<1x16x16xf32> -> vector<1x16x16xf32>
    "tpu.trace_stop"() : () -> ()
    %cst_10 = arith.constant dense<0xFF800000> : vector<1x16xf32>
    %20 = vector.multi_reduction <maximumf>, %19, %cst_10 [2] : vector<1x16x16xf32> to vector<1x16xf32>
    %21 = vector.shape_cast %20 : vector<1x16xf32> to vector<1x16x1xf32>
    %22 = vector.broadcast %21 : vector<1x16x1xf32> to vector<1x16x16xf32>
    %23 = arith.subf %19, %22 : vector<1x16x16xf32>
    %24 = math.exp %23 : vector<1x16x16xf32>
    %cst_11 = arith.constant dense<0.000000e+00> : vector<1x16xf32>
    %25 = vector.multi_reduction <add>, %24, %cst_11 [2] : vector<1x16x16xf32> to vector<1x16xf32>
    %26 = vector.shape_cast %25 : vector<1x16xf32> to vector<1x16x1xf32>
    %27 = tpu.reciprocal %26 {approx = true} : vector<1x16x1xf32> -> vector<1x16x1xf32>
    %28 = vector.broadcast %27 : vector<1x16x1xf32> to vector<1x16x16xf32>
    %29 = arith.mulf %24, %28 : vector<1x16x16xf32>
    %30 = arith.truncf %29 : vector<1x16x16xf32> to vector<1x16x16xbf16>
    "tpu.trace_start"() <{level = 10 : i32, message = "bqk,bkd->bqd"}> : () -> ()
    %cst_12 = arith.constant dense<0.000000e+00> : vector<1x16x64xf32>
    %31 = tpu.matmul %30, %18, %cst_12 {dimension_numbers = #tpu.dot_dimension_numbers<[2], [1], [1], [2], [0, 0, 0, 1, 1, 2], [0], [0]>} : vector<1x16x16xbf16>, vector<1x16x64xbf16>, vector<1x16x64xf32> -> vector<1x16x64xf32>
    "tpu.trace_stop"() : () -> ()
    %c0_13 = arith.constant 0 : index
    %c0_14 = arith.constant 0 : index
    %c0_15 = arith.constant 0 : index
    %32 = vector.load %arg11[%c0_13, %c0_14, %c0_15] : memref<1x16x128xf32, #tpu.memory_space<vmem>>, vector<1x16x128xf32>
    %33 = vector.shape_cast %31 : vector<1x16x64xf32> to vector<16x64xf32>
    %34 = arith.truncf %33 : vector<16x64xf32> to vector<16x64xbf16>
    %c0_16 = arith.constant 0 : index
    %c0_17 = arith.constant 0 : index
    %c0_18 = arith.constant 0 : index
    %35 = vector.load %arg5[%c0_16, %c0_17, %c0_18] : memref<1x64x128xbf16, #tpu.memory_space<vmem>>, vector<1x64x128xbf16>
    %36 = vector.shape_cast %35 : vector<1x64x128xbf16> to vector<64x128xbf16>
    %cst_19 = arith.constant dense<0.000000e+00> : vector<16x128xf32>
    %37 = tpu.matmul %34, %36, %cst_19 {dimension_numbers = #tpu.dot_dimension_numbers<[1], [0], [0], [1], [0, 0, 1, 1], [], []>} : vector<16x64xbf16>, vector<64x128xbf16>, vector<16x128xf32> -> vector<16x128xf32>
    %38 = vector.shape_cast %37 : vector<16x128xf32> to vector<1x16x128xf32>
    %39 = arith.addf %32, %38 : vector<1x16x128xf32>
    %c0_20 = arith.constant 0 : index
    %c0_21 = arith.constant 0 : index
    %c0_22 = arith.constant 0 : index
    %40 = vector.load %arg11[%c0_20, %c0_21, %c0_22] : memref<1x16x128xf32, #tpu.memory_space<vmem>>, vector<1x16x128xf32>
    tpu.vector_store %arg11[%c0_20, %c0_21, %c0_22], %39 {strides = array<i32>} : memref<1x16x128xf32, #tpu.memory_space<vmem>>, vector<1x16x128xf32>,
    %c1_i32 = arith.constant 1 : i32
    %41 = arith.cmpi eq, %arg1, %c1_i32 : i32
    %42 = arith.extui %41 : i1 to i32
    %c0_i32_23 = arith.constant 0 : i32
    %43 = arith.cmpi ne, %42, %c0_i32_23 : i32
    scf.if %43 {
      %c0_24 = arith.constant 0 : index
      %c0_25 = arith.constant 0 : index
      %c0_26 = arith.constant 0 : index
      %44 = vector.load %arg11[%c0_24, %c0_25, %c0_26] : memref<1x16x128xf32, #tpu.memory_space<vmem>>, vector<1x16x128xf32>
      %c0_27 = arith.constant 0 : index
      %c0_28 = arith.constant 0 : index
      %45 = vector.load %arg6[%c0_27, %c0_28] : memref<1x128xf32, #tpu.memory_space<vmem>>, vector<1x128xf32>
      %46 = vector.shape_cast %45 : vector<1x128xf32> to vector<1x1x128xf32>
      %47 = vector.broadcast %46 : vector<1x1x128xf32> to vector<1x16x128xf32>
      %48 = arith.addf %44, %47 : vector<1x16x128xf32>
      %c0_29 = arith.constant 0 : index
      %c0_30 = arith.constant 0 : index
      %c0_31 = arith.constant 0 : index
      %49 = vector.load %arg2[%c0_29, %c0_30, %c0_31] : memref<1x16x128xf32, #tpu.memory_space<vmem>>, vector<1x16x128xf32>
      %50 = arith.addf %48, %49 : vector<1x16x128xf32>
      %cst_32 = arith.constant dense<0.000000e+00> : vector<1x16xf32>
      %51 = vector.multi_reduction <add>, %50, %cst_32 [2] : vector<1x16x128xf32> to vector<1x16xf32>
      %52 = vector.shape_cast %51 : vector<1x16xf32> to vector<1x16x1xf32>
      %cst_33 = arith.constant 1.280000e+02 : f32
      %53 = vector.broadcast %cst_33 : f32 to vector<1x16x1xf32>
      %54 = arith.divf %52, %53 : vector<1x16x1xf32>
      %55 = vector.broadcast %54 : vector<1x16x1xf32> to vector<1x16x128xf32>
      %56 = arith.subf %50, %55 : vector<1x16x128xf32>
      %57 = arith.mulf %56, %56 : vector<1x16x128xf32>
      %cst_34 = arith.constant dense<0.000000e+00> : vector<1x16xf32>
      %58 = vector.multi_reduction <add>, %57, %cst_34 [2] : vector<1x16x128xf32> to vector<1x16xf32>
      %59 = vector.shape_cast %58 : vector<1x16xf32> to vector<1x16x1xf32>
      %cst_35 = arith.constant 1.280000e+02 : f32
      %60 = vector.broadcast %cst_35 : f32 to vector<1x16x1xf32>
      %61 = arith.divf %59, %60 : vector<1x16x1xf32>
      %62 = vector.broadcast %54 : vector<1x16x1xf32> to vector<1x16x128xf32>
      %63 = arith.subf %50, %62 : vector<1x16x128xf32>
      %cst_36 = arith.constant 9.99999996E-13 : f32
      %64 = vector.broadcast %cst_36 : f32 to vector<1x16x1xf32>
      %65 = arith.addf %61, %64 : vector<1x16x1xf32>
      %66 = math.rsqrt %65 : vector<1x16x1xf32>
      %67 = vector.broadcast %66 : vector<1x16x1xf32> to vector<1x16x128xf32>
      %68 = arith.mulf %63, %67 : vector<1x16x128xf32>
      %c0_37 = arith.constant 0 : index
      %c0_38 = arith.constant 0 : index
      %69 = vector.load %arg7[%c0_37, %c0_38] : memref<1x128xf32, #tpu.memory_space<vmem>>, vector<1x128xf32>
      %70 = vector.shape_cast %69 : vector<1x128xf32> to vector<1x1x128xf32>
      %71 = vector.broadcast %70 : vector<1x1x128xf32> to vector<1x16x128xf32>
      %72 = arith.mulf %68, %71 : vector<1x16x128xf32>
      %c0_39 = arith.constant 0 : index
      %c0_40 = arith.constant 0 : index
      %73 = vector.load %arg8[%c0_39, %c0_40] : memref<1x128xf32, #tpu.memory_space<vmem>>, vector<1x128xf32>
      %74 = vector.shape_cast %73 : vector<1x128xf32> to vector<1x1x128xf32>
      %75 = vector.broadcast %74 : vector<1x1x128xf32> to vector<1x16x128xf32>
      %76 = arith.addf %72, %75 : vector<1x16x128xf32>
      %c0_41 = arith.constant 0 : index
      %c0_42 = arith.constant 0 : index
      %c0_43 = arith.constant 0 : index
      %77 = vector.load %arg9[%c0_41, %c0_42, %c0_43] : memref<1x16x128xf32, #tpu.memory_space<vmem>>, vector<1x16x128xf32>
      tpu.vector_store %arg9[%c0_41, %c0_42, %c0_43], %76 {strides = array<i32>} : memref<1x16x128xf32, #tpu.memory_space<vmem>>, vector<1x16x128xf32>,
    } else {
    }
    return
  }
  func.func @transform_0(%arg0: i32, %arg1: i32) -> (i32, i32, i32) {
    %c0_i32 = arith.constant 0 : i32
    %c0_i32_0 = arith.constant 0 : i32
    %c0_i32_1 = arith.constant 0 : i32
    return %arg0, %c0_i32, %c0_i32_0 : i32, i32, i32
  }
  func.func @transform_1(%arg0: i32, %arg1: i32) -> (i32, i32, i32) {
    %c0_i32 = arith.constant 0 : i32
    %c0_i32_0 = arith.constant 0 : i32
    %c0_i32_1 = arith.constant 0 : i32
    return %arg1, %c0_i32, %c0_i32_0 : i32, i32, i32
  }
  func.func @transform_2(%arg0: i32, %arg1: i32) -> (i32, i32, i32) {
    %c0_i32 = arith.constant 0 : i32
    %c0_i32_0 = arith.constant 0 : i32
    %c0_i32_1 = arith.constant 0 : i32
    return %arg1, %c0_i32, %c0_i32_0 : i32, i32, i32
  }
  func.func @transform_3(%arg0: i32, %arg1: i32) -> (i32, i32, i32) {
    %c0_i32 = arith.constant 0 : i32
    %c0_i32_0 = arith.constant 0 : i32
    %c0_i32_1 = arith.constant 0 : i32
    return %arg1, %c0_i32, %c0_i32_0 : i32, i32, i32
  }
  func.func @transform_4(%arg0: i32, %arg1: i32) -> (i32, i32) {
    %c0_i32 = arith.constant 0 : i32
    %c0_i32_0 = arith.constant 0 : i32
    %c0_i32_1 = arith.constant 0 : i32
    return %c0_i32, %c0_i32_0 : i32, i32
  }
  func.func @transform_5(%arg0: i32, %arg1: i32) -> (i32, i32) {
    %c0_i32 = arith.constant 0 : i32
    %c0_i32_0 = arith.constant 0 : i32
    %c0_i32_1 = arith.constant 0 : i32
    return %c0_i32, %c0_i32_0 : i32, i32
  }
  func.func @transform_6(%arg0: i32, %arg1: i32) -> (i32, i32) {
    %c0_i32 = arith.constant 0 : i32
    %c0_i32_0 = arith.constant 0 : i32
    %c0_i32_1 = arith.constant 0 : i32
    return %c0_i32, %c0_i32_0 : i32, i32
  }
  func.func @transform_7(%arg0: i32, %arg1: i32) -> (i32, i32, i32) {
    %c0_i32 = arith.constant 0 : i32
    %c0_i32_0 = arith.constant 0 : i32
    %c0_i32_1 = arith.constant 0 : i32
    return %arg0, %c0_i32, %c0_i32_0 : i32, i32, i32
  }
}

</mosaic_0001>

<bundles_post_ra>
// kernel: tpu_custom_call.1
= control target key start
LH: loop header
LB: loop body
LE: loop exit
PB: predicated region body
PF: predicated region fallthrough
CT: control target
= control target key end

     0   :  { %12 = vsyncpa [#allocation5], 0  ;;  %s1485_s0 = inlined_call_operand.vmem [shape: f32[2,16,128], index: 0, kind: input, shape index: {}]   ;;  %s1486_s1 = inlined_call_operand.vmem [shape: bf16[2,128,192], index: 1, kind: input, shape index: {}]   ;;  %s1487_s2 = inlined_call_operand.vmem [shape: f32[2,1,192], index: 2, kind: input, shape index: {}]   ;;  %s1488_s3 = inlined_call_operand.vmem [shape: bf16[2,64,128], index: 3, kind: input, shape index: {}]   ;;  %s1489_s4 = inlined_call_operand.vmem [shape: f32[1,128], index: 4, kind: input, shape index: {}]   ;;  %s1490_s5 = inlined_call_operand.vmem [shape: f32[1,128], index: 5, kind: input, shape index: {}]   ;;  %s1491_s6 = inlined_call_operand.vmem [shape: f32[1,128], index: 6, kind: input, shape index: {}]   ;;  %s1492_s7 = inlined_call_operand.hbm [shape: f32[2,16,128], index: 7, kind: output, shape index: {}]  }
   0x1   :  { %14 = vsyncpa [#allocation5 + $0x1], 0  ;;  %s1267_s24 = smov 0   ;;  %s1269_s25 = smov 0  }
   0x2   :  { %s1271_s26 = smov 0   ;;  %s1273_s27 = smov 0  }
   0x3   :  { %s1275_s28 = smov 0   ;;  %s1277_s29 = smov 0  }
   0x4   :  { %s1279_s30 = smov 0   ;;  %s1281_s8 = smov 0  }
   0x5 LB: > { %1500 = sst [smem:[#allocation7_spill]] %s1189_s24  ;;  %s913_s9 = sadd.s32 4294967295, %s1217_s8   ;;  %s1217_s8 = sphi %s1281_s8, %s20_s8   ;;  %s1213_s30 = sphi %s1279_s30, %s1518_s30   ;;  %s1209_s29 = sphi %s1277_s29, %s1517_s29   ;;  %s1205_s28 = sphi %s1275_s28, %s1516_s28   ;;  %s1201_s27 = sphi %s1273_s27, %s1515_s27   ;;  %s1197_s26 = sphi %s1271_s26, %s1514_s26   ;;  %s1193_s25 = sphi %s1269_s25, %s1520_s25   ;;  %s1189_s24 = sphi %s1267_s24, %s1519_s24  }
   0x6   : > { %1501 = sst [smem:[#allocation8_spill]] %s1197_s26  ;;  %s914_s10 = sadd.s32 4294967294, %s1217_s8  }
   0x7   : > { %1502 = sst [smem:[#allocation9_spill]] %s1209_s29  ;;  %s29_s11 = sadd.s32 1, %s1209_s29 }
   0x8   : > { %1503 = sst [smem:[#allocation10_spill]] %s1213_s30  ;;  %p30_p0 = scmp.ge.s32.totalorder %s29_s11, 2 }
   0x9   : > { %s32_s12 = sadd.s32 1, %s1213_s30  ;;  %p216_p1 = scmp.ne.s32.totalorder %s1197_s26, %s1193_s25 }
   0xa   : > { %p217_p2 = scmp.eq.s32.totalorder %s913_s9, 3  ;;  %s1522_s11 = smov (%p30_p0, %s29_s11), 0 }
   0xb   : > { %1504 = sst [smem:[#allocation11_spill]] %s1522_s11  ;;  %s1524_s12 = smov (!%p30_p0, %s32_s12), %s1213_s30 }
   0xc   : > { %p1316_p3 = por %p217_p2, %p216_p1  ;;  %p222_p4 = scmp.ne.s32.totalorder %s1193_s25, %s1189_s24 }
   0xd   : > { %p34_p5 = scmp.ge.s32.totalorder %s1524_s12, 2  ;;  %p223_p6 = scmp.eq.s32.totalorder %s914_s10, 3 }
   0xe   : > { %p917_p7 = scmp.ge.s32.totalorder %s1217_s8, 1  ;;  %p281_p8 = scmp.lt.s32.totalorder %s1217_s8, 5 }
   0xf   : > { %s1526_s12 = smov (%p34_p5, %s1524_s12), 0  ;;  %p1326_p9 = por %p223_p6, %p222_p4 }
  0x10   : > { %1506 = sst [smem:[#allocation12_spill]] %s1526_s12  ;;  %p282_p10 = pnand %p917_p7, %p281_p8 }
  0x11   : > { %s1507_s14 = scalar_select %p1326_p9, 1, 0 }
  0x12   : > { %s203_s15 = ssub.s32 %s1213_s30, %s1526_s12  ;;  %s206_s16 = sadd.s32 1, %s1197_s26 }
  0x13   : > { %1508 = sst [smem:[#allocation13_spill]] %s1507_s14  ;;  %p204_p11 = scmp.eq.s32.totalorder %s203_s15, 0 }
  0x14   : > { %285 = sbr.rel (%p282_p10) target bundleno = 1646 (0x66e), region = 48  ;;  %s1496_s18 = sand.u32 (!%p282_p10), 1, %s1193_s25  }
  0x15   : > { %s1334_s17 = scalar_select %p204_p11, %s1197_s26, %s206_s16  }
  0x16   : > { %p327_p12 = scmp.lt.s32.totalorder (!%p282_p10), %s1205_s28, 1  ;;  %s918_s19 = sshll.u32 (!%p282_p10), %s1496_s18, 4 }
  0x17   : > { %1509 = sst [smem:[#allocation14_spill]] %s1334_s17  ;;  %p332_p13 = scmp.lt.s32.totalorder (!%p282_p10), %s1201_s27, 1 }
  0x18   : > { %p926_p0 = scmp.ne.s32.totalorder (!%p282_p10), %s1201_s27, 0 }
  0x19   : > { %s328_s20 = scalar_select %p327_p12, %s1205_s28, 1 }
  0x1a   : > { %s333_s21 = scalar_select %p332_p13, %s1201_s27, 1 }
  0x1b   : > { %s962_s22 = sshll.u32 %s328_s20, 4  ;;  %350 = sbr.rel (%p926_p0) target bundleno = 36 (0x24), region = 52 }
  0x1c   : > { %s1346_s10 = scalar_lea.vmem %s1485_s0, %s962_s22  ;;  %s963_s15 = sshll.u32 %s333_s21, 7 }
  0x1d   : > { %s1351_s11 = scalar_lea.vmem %s1486_s1, %s963_s15  ;;  %s923_s30 = sshll.u32 %s333_s21, 1 }
  0x1e   : > { %s1356_s18 = scalar_lea.vmem %s1487_s2, %s923_s30  ;;  %s964_s26 = sshll.u32 %s333_s21, 5 }
  0x1f   : > { %s1361_s24 = scalar_lea.vmem %s1488_s3, %s964_s26  ;;  %s1363_s22 = scalar_lea.vmem [#allocation4], %s918_s19 }
  0x20   : > { %v351_v0 = vld [vmem:[%s1346_s10] sm:$0xff]  ;;  %v352_v1 = vld [vmem:[%s1346_s10 + $0x8] sm:$0xff]  ;;  %v1219_v3 = vmov 0.0  }
  0x21   : > { %v971_v2 = vpack.c.bf16 %v352_v1, %v351_v0  ;;  %363 = vst [vmem:[#allocation3] sm:$0xff] %v1219_v3  ;;  %364 = vst [vmem:[#allocation3 + $0x8] sm:$0xff] %v1219_v3 }
  0x23   : > { %972 = vst [vmem:[#allocation2] sm:$0xff] %v971_v2  }
  0x24 PF: > { %v1084_v4 = vld [vmem:[%s1351_s11 + $0x74] ss:$8 sps:$4 sm:$0xff]   ;;  %v1086_v5 = vld [vmem:[%s1351_s11 + $0x70] ss:$8 sps:$4 sm:$0xff]   ;;  %v1220_v6 = vmov 0   ;;  %v385_v22 = vlaneseq  ;;  %v1221_v24 = vmov 0.0  }
  0x25   : > { %513 = vmatprep.mubr.bf16.mxu0 %v1220_v6  ;;  %481 = vmatprep.subr.bf16.mxu0 %v1084_v4  ;;  %v1087_v7 = vld [vmem:[%s1351_s11 + $0x64] ss:$8 sps:$4 sm:$0xff]   ;;  %v1089_v8 = vld [vmem:[%s1351_s11 + $0x60] ss:$8 sps:$4 sm:$0xff]   ;;  %v1090_v9 = vld [vmem:[%s1351_s11 + $0x54] ss:$8 sps:$4 sm:$0xff]  }
  0x26   : > { %482 = vmatpush1.bf16.msra.mxu0 %v1086_v5  ;;  %v1092_v10 = vld [vmem:[%s1351_s11 + $0x50] ss:$8 sps:$4 sm:$0xff]   ;;  %v1093_v11 = vld [vmem:[%s1351_s11 + $0x44] ss:$8 sps:$4 sm:$0xff]   ;;  %v1095_v12 = vld [vmem:[%s1351_s11 + $0x40] ss:$8 sps:$4 sm:$0xff]   ;;  %982 = vmatprep.subr.bf16.mxu1 %v1221_v24 }
  0x27   : > { %483 = vmatprep.subr.bf16.mxu0 %v1087_v7  ;;  %v1096_v13 = vld [vmem:[%s1351_s11 + $0x34] ss:$8 sps:$4 sm:$0xff]   ;;  %v1098_v14 = vld [vmem:[%s1351_s11 + $0x30] ss:$8 sps:$4 sm:$0xff]   ;;  %v1099_v15 = vld [vmem:[%s1351_s11 + $0x24] ss:$8 sps:$4 sm:$0xff]  }
  0x28   : > { %v1101_v16 = vld [vmem:[%s1351_s11 + $0x20] ss:$8 sps:$4 sm:$0xff]   ;;  %v1102_v17 = vld [vmem:[%s1351_s11 + $0x14] ss:$8 sps:$4 sm:$0xff]   ;;  %v1104_v18 = vld [vmem:[%s1351_s11 + $0x10] ss:$8 sps:$4 sm:$0xff]  }
  0x29   : > { %v1105_v19 = vld [vmem:[%s1351_s11 + $0x4] ss:$8 sps:$4 sm:$0xff]   ;;  %v1107_v20 = vld [vmem:[%s1351_s11] ss:$8 sps:$4 sm:$0xff]   ;;  %v386_v23 = vshrl.u32 %v385_v22, 7  ;;  %vm1222_vm0 = vmmov 0  }
  0x2a   : > { %484 = vmatpush1.bf16.msra.mxu0 %v1089_v8  ;;  %v1108_v21 = vld [vmem:[#allocation2] sm:$0xff]   ;;  %984 = vmatprep.mubr.msk.bf16.mxu1 %vm1222_vm0, %v1221_v24  ;;  %s1223_s26 = smov 64   ;;  %vm529_vm1 = vcmask 523264   ;;  %vm577_vm2 = vcmask 130048   ;;  %v1109_v0 = vld [vmem:[%s1361_s24 + $0x18] sm:$0xff]   ;;  %v1110_v2 = vld [vmem:[%s1361_s24 + $0x10] sm:$0xff]  }
  0x2b   : > { %485 = vmatprep.subr.bf16.mxu0 %v1090_v9  ;;  %v387_v25 = vsub.s32 0, %v386_v23  ;;  %v383_v26 = vld [vmem:[%s1356_s18] sm:$0x3]  ;;  %v391_v34 = vsub.s32 1, %v386_v23  ;;  %v1111_v3 = vld [vmem:[%s1361_s24 + $0x8] sm:$0xff]   ;;  %p953_p1 = scmp.ne.s32.totalorder %s1201_s27, 1 }
  0x2c   : > { %v1112_v4 = vld [vmem:[%s1361_s24] sm:$0xff]  }
  0x2d   : > { %v388_v28 = vrot.slane %v383_v26, %v387_v25  ;;  %v392_v38 = vrot.slane %v383_v26, %v391_v34 }
  0x2e   : > { %486 = vmatpush1.bf16.msra.mxu0 %v1092_v10  ;;  %v645_v10 = vld [vmem:[#allocation3] sm:$0xff] }
  0x2f   : > { %487 = vmatprep.subr.bf16.mxu0 %v1093_v11 }
  0x32   : > { %488 = vmatpush1.bf16.msra.mxu0 %v1095_v12 }
  0x33   : > { %489 = vmatprep.subr.bf16.mxu0 %v1096_v13 }
  0x36   : > { %490 = vmatpush1.bf16.msra.mxu0 %v1098_v14  ;;  %v646_v14 = vld [vmem:[#allocation3 + $0x8] sm:$0xff] }
  0x37   : > { %491 = vmatprep.subr.bf16.mxu0 %v1099_v15 }
  0x3a   : > { %492 = vmatpush1.bf16.msra.mxu0 %v1101_v16 }
  0x3b   : > { %493 = vmatprep.subr.bf16.mxu0 %v1102_v17 }
  0x3e   : > { %494 = vmatpush1.bf16.msra.mxu0 %v1104_v18 }
  0x3f   : > { %495 = vmatprep.subr.bf16.mxu0 %v1105_v19 }
  0x42   : > { %496 = vmatpush1.bf16.msra.mxu0 %v1107_v20 }
  0x45   : > { %514 = vmatmul.mubr.bf16.vlgmr.msra.gmra.mxu0 %v1108_v21 }
 0x105   : > { %v515_v27 = vpop.f32.mrf.mxu0 }
 0x106   : > { %v516_v31 = vadd.f32 %v515_v27, %v388_v28 }
 0x107   : > { %v517_v29 = vpop.f32.mrf.mxu0 }
 0x108   : > { %v518_v40 = vadd.f32 %v517_v29, %v392_v38 }
 0x109   : > { %v519_v30 = vpop.f32.mrf.mxu0 }
 0x10a   : > { %v520_v32 = vadd.f32 %v519_v30, %v388_v28 }
 0x10b   : > { %v521_v36 = vpop.f32.mrf.mxu0 }
 0x10c   : > { %v524_v33 = vpack.c.bf16 %v520_v32, %v516_v31  ;;  %v522_v39 = vadd.f32 %v521_v36, %v392_v38 }
 0x10e   : > { %527 = vrot.lane.b32.xlu0 %v524_v33, %s1223_s26  ;;  %v525_v41 = vpack.c.bf16 %v522_v39, %v518_v40 }
 0x180   : > { %v528_v35 = vpop.permute.xlu0 %527 }
 0x181   : > { %v534_v37 = vsel %vm529_vm1, %v528_v35, 0 }
 0x182   : > { %983 = vmatpush3.bf16.xpose.msra.mxu1 %v534_v37 }
 0x183   : > { %988 = vmatprep.subr.bf16.mxu1 %v1221_v24 }
 0x189   : > { %985 = vmatmul.mubr.msk.bf16.vlgmr.msra.gmra.mxu1 %vm529_vm1, %v524_v33 }
 0x18a   : > { %989 = vmatpush3.bf16.msra.mxu1 %v525_v41  ;;  %990 = vmatprep.mubr.msk.bf16.mxu1 %vm1222_vm0, %v1221_v24 }
 0x18b   : > { %994 = vmatprep.subr.bf16.mxu1 %v1221_v24 }
 0x249   : > { %v570_v42 = vpop.f32.mrf.mxu1 }
 0x24a   : > { %v578_v43 = vsel %vm577_vm2, %v570_v42, -inf }
 0x24b   : > { %579 = vmax.xlane.f32.xlu0 %v578_v43  ;;  %v986_v44 = vpop.f32.mrf.mxu1 }
 0x24d   : > { %v573_v45 = vpop.f32.mrf.mxu1 }
 0x24e   : > { %v581_v46 = vsel %vm577_vm2, %v573_v45, -inf }
 0x24f   : > { %582 = vmax.xlane.f32.xlu1 %v581_v46  ;;  %v987_v47 = vpop.f32.mrf.mxu1 }
 0x2d4   : > { %v580_v48 = vpop.xlane.xlu0 %579 }
 0x2d5   : > { %v584_v49 = vsub.f32 %v570_v42, %v580_v48 }
 0x2d7   : > { %v586_v50 = vmul.f32 1.442695, %v584_v49 }
 0x2d8   : > { %v583_v51 = vpop.xlane.xlu1 %582 }
 0x2d9   : > { %1113 = vpow2.f32 %v586_v50  ;;  %v585_v52 = vsub.f32 %v573_v45, %v583_v51 }
 0x2db   : > { %v588_v53 = vmul.f32 1.442695, %v585_v52 }
 0x2dd   : > { %1115 = vpow2.f32 %v588_v53 }
 0x2e6   : > { %v1114_v54 = vpop.eup %1113 }
 0x2e7   : > { %v590_v55 = vsel %vm577_vm2, %v1114_v54, 0.0 }
 0x2e8   : > { %591 = vadd.xlane.f32.xlu1 %v590_v55 }
 0x2ea   : > { %v1116_v56 = vpop.eup %1115 }
 0x2eb   : > { %v593_v57 = vsel %vm577_vm2, %v1116_v56, 0.0 }
 0x2ec   : > { %594 = vadd.xlane.f32.xlu1 %v593_v57 }
 0x371   : > { %v592_v58 = vpop.xlane.xlu1 %591 }
 0x372   : > { %1117 = vrcp.f32 %v592_v58 }
 0x375   : > { %v595_v59 = vpop.xlane.xlu1 %594 }
 0x376   : > { %1119 = vrcp.f32 %v595_v59 }
 0x37f   : > { %v1118_v60 = vpop.eup %1117 }
 0x380   : > { %v598_v63 = vmul.f32 %v1118_v60, %v1114_v54 }
 0x383   : > { %v1120_v61 = vpop.eup %1119 }
 0x384   : > { %v599_v62 = vmul.f32 %v1120_v61, %v1116_v56 }
 0x386   : > { %v600_v1 = vpack.c.bf16 %v599_v62, %v598_v63 }
 0x388   : > { %991 = vmatmul.mubr.msk.bf16.vlgmr.msra.gmra.mxu1 %vm577_vm2, %v600_v1 }
 0x389   : > { %995 = vmatpush3.bf16.msra.mxu1 %v1109_v0  ;;  %1002 = vmatprep.mubr.msk.bf16.mxu1 %vm1222_vm0, %v1221_v24 }
 0x38a   : > { %996 = vmatprep.subr.bf16.mxu1 %v1221_v24 }
 0x38d   : > { %997 = vmatpush3.bf16.msra.mxu1 %v1110_v2 }
 0x38e   : > { %998 = vmatprep.subr.bf16.mxu1 %v1221_v24 }
 0x391   : > { %999 = vmatpush3.bf16.msra.mxu1 %v1111_v3 }
 0x392   : > { %1000 = vmatprep.subr.bf16.mxu1 %v1221_v24 }
 0x395   : > { %1001 = vmatpush3.bf16.msra.mxu1 %v1112_v4 }
 0x448   : > { %v638_v5 = vpop.f32.mrf.mxu1 }
 0x44a   : > { %v992_v6 = vpop.f32.mrf.mxu1 }
 0x44c   : > { %v641_v7 = vpop.f32.mrf.mxu1 }
 0x44d   : > { %v647_v8 = vpack.c.bf16 %v641_v7, %v638_v5 }
 0x44e   : > { %v993_v9 = vpop.f32.mrf.mxu1 }
 0x44f   : > { %1003 = vmatmul.mubr.msk.bf16.vlgmr.msra.gmra.mxu1 %vm529_vm1, %v647_v8 }
 0x50f   : > { %v717_v11 = vpop.f32.mrf.mxu1 }
 0x510   : > { %v724_v12 = vadd.f32 %v717_v11, %v645_v10 }
 0x511   : > { %v1004_v13 = vpop.f32.mrf.mxu1 }
 0x512   : > { %726 = vst [vmem:[#allocation3] sm:$0xff] %v724_v12  ;;  %731 = sbr.rel (%p953_p1) target bundleno = 1621 (0x655), region = 56 }
 0x513   : > { %v720_v15 = vpop.f32.mrf.mxu1 }
 0x514   : > { %v725_v16 = vadd.f32 %v720_v15, %v646_v14 }
 0x515   : > { %v1005_v17 = vpop.f32.mrf.mxu1 }
 0x516   : > { %727 = vst [vmem:[#allocation3 + $0x8] sm:$0xff] %v725_v16 }
 0x517   : > { %v954_v19 = vld [vmem:[%s1489_s4] ss:$0 sm:$0xff]  ;;  %v744_v24 = vld [vmem:[%s1346_s10 + $0x8] sm:$0xff] }
 0x518   : > { %v743_v20 = vld [vmem:[%s1346_s10] sm:$0xff] }
 0x519   : > { %v732_v18 = vld [vmem:[#allocation3] sm:$0xff]  ;;  %v955_v42 = vld [vmem:[%s1490_s5] ss:$0 sm:$0xff] }
 0x51a   : > { %v741_v21 = vadd.f32 %v954_v19, %v732_v18  ;;  %v956_v44 = vld [vmem:[%s1491_s6] ss:$0 sm:$0xff] }
 0x51c   : > { %v745_v25 = vadd.f32 %v743_v20, %v741_v21 }
 0x51d   : > { %v733_v22 = vld [vmem:[#allocation3 + $0x8] sm:$0xff] }
 0x51e   : > { %v742_v23 = vadd.f32 %v954_v19, %v733_v22  ;;  %747 = vadd.xlane.f32.xlu0 %v745_v25 }
 0x520   : > { %v746_v26 = vadd.f32 %v744_v24, %v742_v23 }
 0x522   : > { %749 = vadd.xlane.f32.xlu0 %v746_v26 }
 0x5a7   : > { %v748_v27 = vpop.xlane.xlu0 %747 }
 0x5a8   : > { %v752_v28 = vmul.f32 0.0078125, %v748_v27 }
 0x5aa   : > { %v754_v29 = vsub.f32 %v745_v25, %v752_v28 }
 0x5ab   : > { %v750_v30 = vpop.xlane.xlu0 %749 }
 0x5ac   : > { %v753_v31 = vmul.f32 0.0078125, %v750_v30  ;;  %v756_v32 = vmul.f32 %v754_v29, %v754_v29 }
 0x5ae   : > { %v755_v33 = vsub.f32 %v746_v26, %v753_v31  ;;  %758 = vadd.xlane.f32.xlu1 %v756_v32 }
 0x5b0   : > { %v757_v34 = vmul.f32 %v755_v33, %v755_v33 }
 0x5b2   : > { %760 = vadd.xlane.f32.xlu1 %v757_v34 }
 0x637   : > { %v759_v35 = vpop.xlane.xlu1 %758 }
 0x638   : > { %v762_v36 = vmul.f32 0.0078125, %v759_v35 }
 0x63a   : > { %v764_v37 = vadd.f32 1e-12, %v762_v36 }
 0x63b   : > { %v761_v38 = vpop.xlane.xlu1 %760 }
 0x63c   : > { %1121 = vrsqrt.f32 %v764_v37  ;;  %v763_v39 = vmul.f32 0.0078125, %v761_v38 }
 0x63e   : > { %v765_v40 = vadd.f32 1e-12, %v763_v39 }
 0x640   : > { %1123 = vrsqrt.f32 %v765_v40 }
 0x649   : > { %v1122_v41 = vpop.eup %1121 }
 0x64a   : > { %v768_v43 = vmul.f32 %v1122_v41, %v754_v29 }
 0x64c   : > { %v777_v45 = vmul.f32 %v955_v42, %v768_v43 }
 0x64d   : > { %v1124_v46 = vpop.eup %1123 }
 0x64e   : > { %v786_v47 = vadd.f32 %v956_v44, %v777_v45  ;;  %v769_v48 = vmul.f32 %v1124_v46, %v755_v33 }
 0x650   : > { %788 = vst [vmem:[%s1363_s22] sm:$0xff] %v786_v47  ;;  %v778_v49 = vmul.f32 %v955_v42, %v769_v48 }
 0x652   : > { %v787_v50 = vadd.f32 %v956_v44, %v778_v49 }
 0x654   : > { %789 = vst [vmem:[%s1363_s22 + $0x8] sm:$0xff] %v787_v50 }
 0x655 PF: > { %s967_s14 = sshll.u32 %s1205_s28, 8  ;;  %s804_s21 = sshll.u32 %s1363_s22, 4  ;;  %s1430_s21 = int_to_ptr.vmem [resolvable:$true] %s804_s21 }
 0x656   : > { %s1427_s19 = scalar_lea.hbm %s1492_s7, %s967_s14  ;;  %s1510_s23 = sand.u32 1, %s1193_s25  }
 0x657   : > { %s1434_s9 = scalar_lea.sflag [#allocation5], %s1510_s23  ;;  %s1125_s10 = scalar_lea.vmem %s1430_s21, 256 }
 0x658   : > { %p1126_p2 = scmp.ne.s32.totalorder %s1430_s21, %s1125_s10  ;;  %s1224_s28 = smov [#allocation4]  }
 0x659   : > { %s1129_s15 = sshll.u32 %s1224_s28, 4  ;;  %s1130_s15 = int_to_ptr.vmem [resolvable:$false] %s1129_s15 }
 0x65a   : > { %p1127_p4 = pnand %p1126_p2, %p1316_p3  ;;  %s1131_s16 = scalar_lea.vmem %s1130_s15, 512 }
 0x65b   : > { %p1132_p6 = scmp.lt.s32.totalorder %s1430_s21, %s1130_s15  ;;  %p1133_p7 = scmp.lt.s32.totalorder %s1131_s16, %s1125_s10 }
 0x65c   : > { %p1128_p5 = pneg %p1127_p4 }
 0x65d   : > { %p1134_p8 = por %p1133_p7, %p1132_p6 }
 0x65f   : > { %p1135_p10 = pnand %p1134_p8, %p1128_p5 }
 0x661   : > { %1138 = shalt.err (!%p1135_p10)
}
 0x662   : > { %s1139_s20 = scalar_lea.hbm %s1427_s19, 256  ;;  %s1143_s24 = scalar_lea.hbm %s1492_s7, 512 }
 0x663   : > { %p1140_p11 = scmp.ne.s32.totalorder %s1427_s19, %s1139_s20  ;;  %p1144_p0 = scmp.lt.s32.totalorder %s1427_s19, %s1492_s7 }
 0x664   : > { %p1145_p1 = scmp.lt.s32.totalorder %s1143_s24, %s1139_s20 }
 0x665   : > { %p1141_p12 = pnand %p1140_p11, %p1316_p3 }
 0x666   : > { %p1146_p2 = por %p1145_p1, %p1144_p0 }
 0x667   : > { %p1142_p13 = pneg %p1141_p12 }
 0x669   : > { %p1147_p4 = pnand %p1146_p2, %p1142_p13 }
 0x66b   : > { %1150 = shalt.err (!%p1147_p4)
}
 0x66c   : > { %s1225_s30 = smov 128   ;;  %s1226_s11 = smov 8  }
 0x66d   : > { %1006 = dma.vmem_to_hbm [thread:$0]  (%p1316_p3), %s1430_s21, 256, %s1427_s19, %s1434_s9, %s1225_s30, %s1225_s30, %s1226_s11  }
 0x66e PF: > { %s1511_s12 = sld [smem:[#allocation7_spill]]  ;;  %p1012_p5 = scmp.ge.s32.totalorder %s1217_s8, 2 }
 0x670   : > { %p1009_p6 = pnand %p1012_p5, %p1326_p9 }
 0x672   : > { %p1010_p7 = pneg %p1009_p6 }
 0x674   : > { %s819_s17 = sand.u32 1, %s1511_s12  }
 0x675   : > { %s820_s18 = scalar_lea.sflag [#allocation5], %s819_s17 }
 0x676   : > { %1184 = dma.done.wait (%p1010_p7), %s820_s18, 256  }
 0x677   : > { %1186 = vsyncadd (%p1010_p7), %s820_s18, 4294967040  ;;  %s20_s8 = sadd.s32 1, %s1217_s8   ;;  %s1513_s23 = sld [smem:[#allocation8_spill]] }
 0x678   : > { %p17_p8 = scmp.ge.s32.totalorder %s20_s8, 6   ;;  %s1514_s26 = sld [smem:[#allocation14_spill]] }
 0x679   : > { %s1515_s27 = sld [smem:[#allocation9_spill]]  ;;  %s1519_s24 = smov %s1193_s25 }
 0x67a   : > { %s1516_s28 = sld [smem:[#allocation10_spill]]  ;;  %19 = sbr.rel (!%p17_p8) target bundleno = 5 (0x5), region = 100 }
 0x67b   : > { %s1517_s29 = sld [smem:[#allocation11_spill]] }
 0x67c   : > { %s1518_s30 = sld [smem:[#allocation12_spill]] }
 0x67d   : > { %s1520_s25 = smov %s1513_s23 }
 0x67f   :  { %825 = vsyncpa [#allocation5], 1 }
 0x680   :  { %827 = vsyncpa [#allocation5 + $0x1], 1 }

</bundles_post_ra>
